<compile_context>
chip_gen: v5e
topology: v5e:2x2
jax: 0.10.0
libtpu: 0.0.40
codegen_flags: <defaults>
</compile_context>

<pallas_src>
import jax
import jax.numpy as jnp
from jax.experimental import pallas as pl
from jax.experimental.pallas import tpu as pltpu

K = 3  # conv kernel size of the inner module (SAME padding -> pad = 1 per side)


def residual_kernel(x_ref, w_ref, b_ref, o_ref, slab_ref):
    # x_ref   : (C, L)       input slice for this batch element (single HBM read)
    # w_ref   : (K, C, C)    conv weights, tap-major so w_ref[k] is (Cout, Cin)
    # b_ref   : (C, 1)       conv bias
    # o_ref   : (C, L)       output
    # slab_ref: (C, L+K-1)   VMEM scratch: zero-padded copy of x ("SAME" padding)
    C, L = x_ref.shape
    x = x_ref[...].astype(jnp.float32)

    # Build the zero-padded slab in VMEM: [0 | x | 0] along the length axis.
    # Edge columns are re-zeroed every iteration (cheap, and robust under a
    # "parallel" grid axis where scratch persistence is per-core).
    zcol = jnp.zeros((C, 1), jnp.float32)
    slab_ref[:, 0:1] = zcol
    slab_ref[:, L + 1:L + 2] = zcol
    slab_ref[:, 1:L + 1] = x

    # Bias-initialized accumulator (saves one full (C, L) VPU add).
    acc = jnp.broadcast_to(b_ref[...].astype(jnp.float32), (C, L))
    # Static unroll over taps: each tap is a (C,C) @ (C,L) MXU matmul.
    # (For tiny C this op is memory-bound; a single fused (C, K*C) contraction
    #  only pays off once K*C >= 128.)
    for k in range(K):
        acc = acc + jnp.dot(
            w_ref[k], slab_ref[:, k:k + L], preferred_element_type=jnp.float32
        )

    # Residual branch: reuse the already-loaded x (no second HBM read).
    o_ref[...] = (acc + x).astype(o_ref.dtype)


def residual_forward(x, w, b):
    """x: (N, C, L) float32; w: (K, Cout, Cin); b: (C,).  Returns conv1d(x) + x."""
    N, C, L = x.shape
    b2 = b.reshape(C, 1)

    return pl.pallas_call(
        residual_kernel,
        out_shape=jax.ShapeDtypeStruct((N, C, L), x.dtype),
        grid_spec=pltpu.PrefetchScalarGridSpec(
            num_scalar_prefetch=0,
            grid=(N,),
            in_specs=[
                # per-batch input, batch dim squeezed out of the kernel ref
                pl.BlockSpec((None, C, L), lambda n: (n, 0, 0)),
                # weights / bias: same (resident) block for every grid point
                pl.BlockSpec((K, C, C), lambda n: (0, 0, 0)),
                pl.BlockSpec((C, 1), lambda n: (0, 0)),
            ],
            out_specs=pl.BlockSpec((None, C, L), lambda n: (n, 0, 0)),
            scratch_shapes=[pltpu.VMEM((C, L + K - 1), jnp.float32)],
        ),
        compiler_params=pltpu.CompilerParams(dimension_semantics=("parallel",)),
    )(x, w, b2)


if __name__ == "__main__":
    key = jax.random.PRNGKey(0)
    kx, kw, kb = jax.random.split(key, 3)

    N, C, L = 2, 4, 16
    x = jax.random.normal(kx, (N, C, L), dtype=jnp.float32)
    # deterministic synthetic parameters (shapes implied by Conv1d(C, C, K))
    w = 0.1 * jax.random.normal(kw, (K, C, C), dtype=jnp.float32)   # (tap, Cout, Cin)
    b = 0.1 * jax.random.normal(kb, (C,), dtype=jnp.float32)

    y = residual_forward(x, w, b)
    jax.block_until_ready(y)

    # pure-JAX reference: same-padded conv1d + bias + residual
    w_oik = jnp.transpose(w, (1, 2, 0))  # (Cout, Cin, K)
    y_ref = jax.lax.conv_general_dilated(
        x, w_oik, window_strides=(1,), padding="SAME",
        dimension_numbers=("NCH", "OIH", "NCH"),
    ) + b[None, :, None] + x
    assert jnp.allclose(y, y_ref, atol=1e-5, rtol=1e-5), "mismatch vs reference"

    print("KERNEL_OK")
</pallas_src>

<mosaic_0001>
module attributes {stable_mosaic.version = 11 : i64} {
  func.func @residual_kernel(%arg0: i32, %arg1: memref<1x4x16xf32, #tpu.memory_space<vmem>>, %arg2: memref<3x4x4xf32, #tpu.memory_space<vmem>>, %arg3: memref<4x1xf32, #tpu.memory_space<vmem>>, %arg4: memref<1x4x16xf32, #tpu.memory_space<vmem>>, %arg5: memref<4x18xf32, #tpu.memory_space<vmem>>) attributes {dimension_semantics = [#tpu.dimension_semantics<parallel>], iteration_bounds = array<i64: 2>, scalar_prefetch = 0 : i64, scratch_operands = 1 : i64, tpu.core_type = #tpu.core_type<tc>, window_params = [{transform_indices = @transform_0, window_bounds = array<i64: 1, 4, 16>}, {pipeline_mode = #tpu.pipeline_mode<synchronous>, transform_indices = @transform_1, window_bounds = array<i64: 3, 4, 4>}, {pipeline_mode = #tpu.pipeline_mode<synchronous>, transform_indices = @transform_2, window_bounds = array<i64: 4, 1>}, {transform_indices = @transform_3, window_bounds = array<i64: 1, 4, 16>}]} {
    %c0 = arith.constant 0 : index
    %c0_0 = arith.constant 0 : index
    %c0_1 = arith.constant 0 : index
    %0 = vector.load %arg1[%c0, %c0_0, %c0_1] : memref<1x4x16xf32, #tpu.memory_space<vmem>>, vector<1x4x16xf32>
    %1 = vector.shape_cast %0 : vector<1x4x16xf32> to vector<4x16xf32>
    %cst = arith.constant 0.000000e+00 : f32
    %2 = vector.broadcast %cst : f32 to vector<4x1xf32>
    %c0_2 = arith.constant 0 : index
    %c0_3 = arith.constant 0 : index
    %3 = vector.load %arg5[%c0_2, %c0_3] : memref<4x18xf32, #tpu.memory_space<vmem>>, vector<4x1xf32>
    tpu.vector_store %arg5[%c0_2, %c0_3], %2 {strides = array<i32>} : memref<4x18xf32, #tpu.memory_space<vmem>>, vector<4x1xf32>,
    %c0_4 = arith.constant 0 : index
    %c17 = arith.constant 17 : index
    %4 = vector.load %arg5[%c0_4, %c17] : memref<4x18xf32, #tpu.memory_space<vmem>>, vector<4x1xf32>
    tpu.vector_store %arg5[%c0_4, %c17], %2 {strides = array<i32>} : memref<4x18xf32, #tpu.memory_space<vmem>>, vector<4x1xf32>,
    %c0_5 = arith.constant 0 : index
    %c1 = arith.constant 1 : index
    %5 = vector.load %arg5[%c0_5, %c1] : memref<4x18xf32, #tpu.memory_space<vmem>>, vector<4x16xf32>
    tpu.vector_store %arg5[%c0_5, %c1], %1 {strides = array<i32>} : memref<4x18xf32, #tpu.memory_space<vmem>>, vector<4x16xf32>,
    %c0_6 = arith.constant 0 : index
    %c0_7 = arith.constant 0 : index
    %6 = vector.load %arg3[%c0_6, %c0_7] : memref<4x1xf32, #tpu.memory_space<vmem>>, vector<4x1xf32>
    %7 = vector.shape_cast %6 : vector<4x1xf32> to vector<4x1xf32>
    %8 = vector.broadcast %7 : vector<4x1xf32> to vector<4x16xf32>
    %c0_8 = arith.constant 0 : index
    %c0_9 = arith.constant 0 : index
    %c0_10 = arith.constant 0 : index
    %9 = vector.load %arg2[%c0_8, %c0_9, %c0_10] : memref<3x4x4xf32, #tpu.memory_space<vmem>>, vector<1x4x4xf32>
    %10 = vector.shape_cast %9 : vector<1x4x4xf32> to vector<4x4xf32>
    %c0_11 = arith.constant 0 : index
    %c0_12 = arith.constant 0 : index
    %11 = vector.load %arg5[%c0_11, %c0_12] : memref<4x18xf32, #tpu.memory_space<vmem>>, vector<4x16xf32>
    %cst_13 = arith.constant dense<0.000000e+00> : vector<4x16xf32>
    %12 = tpu.matmul %10, %11, %cst_13 {dimension_numbers = #tpu.dot_dimension_numbers<[1], [0], [0], [1], [0, 0, 1, 1], [], []>} : vector<4x4xf32>, vector<4x16xf32>, vector<4x16xf32> -> vector<4x16xf32>
    %13 = arith.addf %8, %12 : vector<4x16xf32>
    %c1_14 = arith.constant 1 : index
    %c0_15 = arith.constant 0 : index
    %c0_16 = arith.constant 0 : index
    %14 = vector.load %arg2[%c1_14, %c0_15, %c0_16] : memref<3x4x4xf32, #tpu.memory_space<vmem>>, vector<1x4x4xf32>
    %15 = vector.shape_cast %14 : vector<1x4x4xf32> to vector<4x4xf32>
    %c0_17 = arith.constant 0 : index
    %c1_18 = arith.constant 1 : index
    %16 = vector.load %arg5[%c0_17, %c1_18] : memref<4x18xf32, #tpu.memory_space<vmem>>, vector<4x16xf32>
    %cst_19 = arith.constant dense<0.000000e+00> : vector<4x16xf32>
    %17 = tpu.matmul %15, %16, %cst_19 {dimension_numbers = #tpu.dot_dimension_numbers<[1], [0], [0], [1], [0, 0, 1, 1], [], []>} : vector<4x4xf32>, vector<4x16xf32>, vector<4x16xf32> -> vector<4x16xf32>
    %18 = arith.addf %13, %17 : vector<4x16xf32>
    %c2 = arith.constant 2 : index
    %c0_20 = arith.constant 0 : index
    %c0_21 = arith.constant 0 : index
    %19 = vector.load %arg2[%c2, %c0_20, %c0_21] : memref<3x4x4xf32, #tpu.memory_space<vmem>>, vector<1x4x4xf32>
    %20 = vector.shape_cast %19 : vector<1x4x4xf32> to vector<4x4xf32>
    %c0_22 = arith.constant 0 : index
    %c2_23 = arith.constant 2 : index
    %21 = vector.load %arg5[%c0_22, %c2_23] : memref<4x18xf32, #tpu.memory_space<vmem>>, vector<4x16xf32>
    %cst_24 = arith.constant dense<0.000000e+00> : vector<4x16xf32>
    %22 = tpu.matmul %20, %21, %cst_24 {dimension_numbers = #tpu.dot_dimension_numbers<[1], [0], [0], [1], [0, 0, 1, 1], [], []>} : vector<4x4xf32>, vector<4x16xf32>, vector<4x16xf32> -> vector<4x16xf32>
    %23 = arith.addf %18, %22 : vector<4x16xf32>
    %24 = arith.addf %23, %1 : vector<4x16xf32>
    %c0_25 = arith.constant 0 : index
    %c0_26 = arith.constant 0 : index
    %c0_27 = arith.constant 0 : index
    %25 = vector.load %arg4[%c0_25, %c0_26, %c0_27] : memref<1x4x16xf32, #tpu.memory_space<vmem>>, vector<1x4x16xf32>
    %26 = vector.shape_cast %25 : vector<1x4x16xf32> to vector<4x16xf32>
    %27 = vector.shape_cast %24 : vector<4x16xf32> to vector<1x4x16xf32>
    tpu.vector_store %arg4[%c0_25, %c0_26, %c0_27], %27 {strides = array<i32>} : memref<1x4x16xf32, #tpu.memory_space<vmem>>, vector<1x4x16xf32>,
    return
  }
  func.func @transform_0(%arg0: i32) -> (i32, i32, i32) {
    %c0_i32 = arith.constant 0 : i32
    %c0_i32_0 = arith.constant 0 : i32
    %c0_i32_1 = arith.constant 0 : i32
    return %arg0, %c0_i32, %c0_i32_0 : i32, i32, i32
  }
  func.func @transform_1(%arg0: i32) -> (i32, i32, i32) {
    %c0_i32 = arith.constant 0 : i32
    %c0_i32_0 = arith.constant 0 : i32
    %c0_i32_1 = arith.constant 0 : i32
    %c0_i32_2 = arith.constant 0 : i32
    return %c0_i32, %c0_i32_0, %c0_i32_1 : i32, i32, i32
  }
  func.func @transform_2(%arg0: i32) -> (i32, i32) {
    %c0_i32 = arith.constant 0 : i32
    %c0_i32_0 = arith.constant 0 : i32
    %c0_i32_1 = arith.constant 0 : i32
    return %c0_i32, %c0_i32_0 : i32, i32
  }
  func.func @transform_3(%arg0: i32) -> (i32, i32, i32) {
    %c0_i32 = arith.constant 0 : i32
    %c0_i32_0 = arith.constant 0 : i32
    %c0_i32_1 = arith.constant 0 : i32
    return %arg0, %c0_i32, %c0_i32_0 : i32, i32, i32
  }
}

</mosaic_0001>

<bundles_post_ra>
// kernel: tpu_custom_call.1
= control target key start
LH: loop header
LB: loop body
LE: loop exit
PB: predicated region body
PF: predicated region fallthrough
CT: control target
= control target key end

     0   :  { %8 = vsyncpa [#allocation4], 0  ;;  %s804_s0 = inlined_call_operand.hbm [shape: f32[2,4,16], index: 0, kind: input, shape index: {}]   ;;  %s805_s1 = inlined_call_operand.hbm [shape: f32[3,4,4], index: 1, kind: input, shape index: {}]   ;;  %s806_s2 = inlined_call_operand.vmem [shape: f32[4,1], index: 2, kind: input, shape index: {}]   ;;  %s807_s3 = inlined_call_operand.hbm [shape: f32[2,4,16], index: 3, kind: output, shape index: {}]  }
   0x1   :  { %10 = vsyncpa [#allocation4 + $0x1], 0 }
   0x2   :  { %11 = vsyncpa [#allocation7], 0 }
   0x3   :  { %12 = vsyncpa [#allocation5], 0 }
   0x4   :  { %14 = vsyncpa [#allocation5 + $0x1], 0  ;;  %s658_s12 = smov 0   ;;  %s660_s13 = smov 0  }
   0x5   :  { %s662_s14 = smov 0   ;;  %s664_s15 = smov 0  }
   0x6 LB: > { %s130_s18 = sshll.u32 %s805_s1, 4  ;;  %s682_s19 = sadd.s32 4294967295, %s628_s15   ;;  %s628_s15 = sphi %s664_s15, %s817_s15   ;;  %s624_s14 = sphi %s662_s14, %s816_s14   ;;  %s620_s13 = sphi %s660_s13, %s815_s13   ;;  %s616_s12 = sphi %s658_s12, %s814_s12   ;;  %s131_s18 = int_to_ptr.hbm [resolvable:$true] %s130_s18 }
   0x7   : > { %p413_p0 = scmp.ge.s32.totalorder %s628_s15, 1  ;;  %p41_p1 = scmp.eq.s32.totalorder %s682_s19, 0 }
   0x8   : > { %p119_p2 = scmp.lt.s32.totalorder %s628_s15, 3  ;;  %s630_s21 = smov [#allocation6]  }
   0x9   : > { %s132_s22 = sshll.u32 %s630_s21, 4  ;;  %s631_s23 = smov 64   ;;  %s133_s22 = int_to_ptr.vmem [resolvable:$true] %s132_s22 }
   0xa   : > { %p687_p3 = pnand %p413_p0, %p119_p2  ;;  %s632_s24 = smov 4  }
   0xb   : > { %s412_s25 = sadd.s32 4294967294, %s628_s15   ;;  %s698_s26 = sadd.s32 1, %s628_s15  }
   0xc   : > { %p440_p4 = pneg %p687_p3  ;;  %s27_s27 = sadd.s32 1, %s624_s14 }
   0xd   : > { %s24_s28 = ssub.s32 %s628_s15, %s698_s26  ;;  %p34_p7 = scmp.ne.s32.totalorder %s624_s14, %s620_s13 }
   0xe   : > { %p441_p6 = pnand %p440_p4, %p41_p1  ;;  %p25_p8 = scmp.eq.s32.totalorder %s24_s28, 0 }
   0xf   : > { %p35_p9 = scmp.eq.s32.totalorder %s628_s15, 0  ;;  %p40_p10 = scmp.ne.s32.totalorder %s620_s13, %s616_s12 }
  0x10   : > { %443 = dma.hbm_to_vmem [thread:$0]  (!%p441_p6), %s131_s18, 192, %s133_s22, [#allocation7], %s631_s23, %s631_s23, %s632_s24  }
  0x11   : > { %p106_p11 = scmp.eq.s32.totalorder %s682_s19, 1  ;;  %p714_p12 = por %p41_p1, %p40_p10 }
  0x12   : > { %s710_s29 = scalar_select %p25_p8, %s624_s14, %s27_s27  }
  0x13   : > { %p718_p13 = por %p106_p11, %p34_p7  ;;  %p112_p0 = scmp.eq.s32.totalorder %s412_s25, 1 }
  0x14   : > { %p36_p2 = por %p35_p9, %p34_p7  ;;  %s149_s5 = sand.u32 1, %s624_s14  }
  0x15   : > { %p723_p4 = por %p112_p0, %p40_p10  ;;  %p453_p6 = scmp.lt.s32.totalorder %s628_s15, 2 }
  0x16   : > { %s416_s7 = sshll.u32 %s149_s5, 2  ;;  %s417_s8 = sshll.u32 %s628_s15, 2 }
  0x17   : > { %s157_s11 = scalar_lea.hbm %s804_s0, %s417_s8  ;;  %s153_s17 = scalar_lea.vmem [#allocation3], %s416_s7 }
  0x18   : > { %s159_s16 = sshll.u32 %s157_s11, 4  ;;  %s161_s18 = sshll.u32 %s153_s17, 4  ;;  %s160_s16 = int_to_ptr.hbm [resolvable:$true] %s159_s16  ;;  %s162_s18 = int_to_ptr.vmem [resolvable:$true] %s161_s18 }
  0x19   : > { %p732_p8 = pnand %p453_p6, %p36_p2  ;;  %s150_s22 = scalar_lea.sflag [#allocation4], %s149_s5 }
  0x1a   : > { %s528_s23 = sshra.s32 %s160_s16, 4  ;;  %s535_s28 = scalar_lea.hbm %s804_s0, 8  ;;  %s529_s23 = int_to_ptr.hbm [resolvable:$true] %s528_s23 }
  0x1b   : > { %s530_s24 = scalar_lea.hbm %s529_s23, 4  ;;  %p532_p9 = pneg %p732_p8 }
  0x1c   : > { %p531_p7 = scmp.ne.s32.totalorder %s529_s23, %s530_s24  ;;  %p536_p0 = scmp.lt.s32.totalorder %s529_s23, %s804_s0 }
  0x1d   : > { %p537_p2 = scmp.lt.s32.totalorder %s535_s28, %s530_s24 }
  0x1e   : > { %p533_p10 = pnand %p532_p9, %p531_p7 }
  0x1f   : > { %p538_p6 = por %p537_p2, %p536_p0 }
  0x20   : > { %p534_p11 = pneg %p533_p10 }
  0x22   : > { %p539_p5 = pnand %p538_p6, %p534_p11 }
  0x24   : > { %542 = shalt.err (!%p539_p5)
}
  0x25   : > { %447 = dma.hbm_to_vmem [thread:$0]  (!%p732_p8), %s160_s16, 64, %s162_s18, %s150_s22  }
  0x26   : > { %170 = sbr.rel (%p687_p3) target bundleno = 426 (0x1aa), region = 32  ;;  %s749_s5 = sand.u32 (!%p687_p3), 1, %s620_s13  }
  0x27   : > { %s419_s9 = sshll.u32 (!%p687_p3), %s749_s5, 2  ;;  %s173_s10 = scalar_lea.sflag (!%p687_p3), [#allocation4], %s749_s5 }
  0x28   : > { %s176_s11 = scalar_lea.vmem (!%p687_p3), [#allocation3], %s419_s9 }
  0x2b   : > { %603 = dma.done.wait (%p714_p12), %s173_s10, 64  }
  0x2c   : > { %605 = vsyncadd (%p714_p12), %s173_s10, 4294967232 }
  0x2d   : > { %607 = dma.done.wait (%p41_p1), [#allocation7], 192  }
  0x2e   : > { %609 = vsyncadd (%p41_p1), [#allocation7], 4294967104  ;;  %vm206_vm0 = vcmask 3072   ;;  %vm208_vm1 = vcmask 142472   ;;  %v633_v0 = vmov 0.0   ;;  %s634_s20 = smov 1  }
  0x2f   : > { %207 = vst.msk [vmem:[#allocation2] sm:$0xf] %vm206_vm0, %v633_v0  ;;  %v205_v1 = vld [vmem:[%s176_s11] sm:$0xf]  ;;  %vm214_vm2 = vcmask 134152   ;;  %vm228_vm3 = vcmask 1043456  }
  0x30   : > { %209 = vst.msk [vmem:[#allocation2] sm:$0xf] %vm208_vm1, %v633_v0  ;;  %211 = vrot.lane.b32.xlu0 %v205_v1, %s634_s20  ;;  %s635_s30 = smov 127   ;;  %s636_s16 = smov 126   ;;  %vm224_vm4 = vcmask 31744   ;;  %v637_v5 = vmov 0  }
  0x31   : > { %v222_v4 = vld [vmem:[#allocation6] sm:$0xf]  ;;  %496 = vset.pattern.permute.xlu1 %v637_v5  ;;  %v216_v6 = vld [vmem:[%s806_s2] sm:$0xf]  ;;  %497 = vset.pattern.permute.xlu0 %v637_v5  ;;  %v284_v7 = vld [vmem:[#allocation6 + $0x8] sm:$0xf] }
  0x32   : > { %v254_v8 = vld [vmem:[#allocation6 + $0x4] sm:$0xf]  ;;  %s429_s21 = sshll.u32 %s682_s19, 2  ;;  %s204_s25 = scalar_lea.vmem [#allocation8], %s419_s9  ;;  %vm314_vm5 = vcmask 125952  }
  0x33   : > { %s327_s24 = scalar_lea.hbm %s807_s3, %s429_s21  ;;  %s329_s27 = sshll.u32 %s204_s25, 4  ;;  %s330_s27 = int_to_ptr.vmem [resolvable:$true] %s329_s27 }
  0x34   : > { %s331_s28 = sshll.u32 %s327_s24, 4  ;;  %s317_s7 = scalar_lea.sflag [#allocation5], %s749_s5  ;;  %s332_s28 = int_to_ptr.hbm [resolvable:$true] %s331_s28 }
  0x35   : > { %s572_s8 = sshra.s32 %s332_s28, 4  ;;  %s578_s9 = scalar_lea.hbm %s807_s3, 8  ;;  %s573_s8 = int_to_ptr.hbm [resolvable:$true] %s572_s8 }
  0x36   : > { %s574_s19 = scalar_lea.hbm %s573_s8, 4  ;;  %p579_p12 = scmp.lt.s32.totalorder %s573_s8, %s807_s3 }
  0x37   : > { %p575_p1 = scmp.ne.s32.totalorder %s573_s8, %s574_s19  ;;  %p580_p8 = scmp.lt.s32.totalorder %s578_s9, %s574_s19 }
  0x39   : > { %p576_p3 = pnand %p575_p1, %p718_p13  ;;  %p581_p7 = por %p580_p8, %p579_p12 }
  0x3b   : > { %p577_p5 = pneg %p576_p3 }
  0x3d   : > { %p582_p9 = pnand %p581_p7, %p577_p5 }
  0xa2   : > { %v212_v2 = vpop.permute.xlu0 %211 }
  0xa3   : > { %215 = vst.msk [vmem:[#allocation2] sm:$0xf] %vm214_vm2, %v212_v2 }
  0xaa   : > { %v223_v3 = vld [vmem:[#allocation2] sm:$0xf] }
  0xab   : > { %255 = vrot.lane.b32.xlu1 %v223_v3, %s635_s30  ;;  %285 = vrot.lane.b32.xlu0 %v223_v3, %s636_s16 }
  0xac   : > { %422 = vmatpush.msk.msra.mxu0 %vm228_vm3, %v223_v3 }
  0xad   : > { %423 = vmatmul.msk.f32.vlgmr.msra.gmra.mxu0 %vm224_vm4, %v222_v4 }
  0xb3   : > { %219 = vperm.xlu1 %496, %v216_v6  }
 0x11d   : > { %v256_v9 = vpop.permute.xlu1 %255  ;;  %v286_v10 = vpop.permute.xlu0 %285 }
 0x11e   : > { %424 = vmatpush.msk.msra.mxu1 %vm228_vm3, %v256_v9  ;;  %426 = vmatpush.msk.msra.mxu2 %vm228_vm3, %v286_v10 }
 0x11f   : > { %427 = vmatmul.msk.f32.vlgmr.msra.gmra.mxu2 %vm224_vm4, %v284_v7  ;;  %425 = vmatmul.msk.f32.vlgmr.msra.gmra.mxu1 %vm224_vm4, %v254_v8 }
 0x125   : > { %v220_v11 = vpop.permute.xlu1 %219 }
 0x12a   : > { %v249_v12 = vpop.f32.mrf.mxu0 }
 0x12b   : > { %v252_v13 = vadd.f32 %v249_v12, %v220_v11 }
 0x19c   : > { %v279_v14 = vpop.f32.mrf.mxu1 }
 0x19d   : > { %v282_v15 = vadd.f32 %v279_v14, %v252_v13 }
 0x1a2   : > { %v309_v16 = vpop.f32.mrf.mxu2 }
 0x1a3   : > { %v312_v17 = vadd.f32 %v309_v16, %v282_v15 }
 0x1a5   : > { %v313_v18 = vadd.f32 %v312_v17, %v205_v1 }
 0x1a7   : > { %315 = vst.msk [vmem:[%s204_s25] sm:$0xf] %vm314_vm5, %v313_v18 }
 0x1a8   : > { %585 = shalt.err (!%p582_p9)
}
 0x1a9   : > { %438 = dma.vmem_to_hbm [thread:$0]  (%p718_p13), %s330_s27, 64, %s332_s28, %s317_s7  }
 0x1aa PF: > { %s343_s5 = sand.u32 1, %s616_s12   ;;  %p813_p10 = scmp.ge.s32.totalorder %s628_s15, 2 }
 0x1ab   : > { %s344_s16 = scalar_lea.sflag [#allocation5], %s343_s5 }
 0x1ac   : > { %p449_p11 = pnand %p813_p10, %p723_p4 }
 0x1ae   : > { %p450_p0 = pneg %p449_p11 }
 0x1b0   : > { %611 = dma.done.wait (%p450_p0), %s344_s16, 64  }
 0x1b1   : > { %613 = vsyncadd (%p450_p0), %s344_s16, 4294967232  ;;  %p17_p2 = scmp.ge.s32.totalorder %s698_s26, 4   ;;  %s814_s12 = smov %s620_s13 }
 0x1b2   : > { %s815_s13 = smov %s624_s14  ;;  %s816_s14 = smov %s710_s29 }
 0x1b3   : > { %s817_s15 = smov %s698_s26  ;;  %19 = sbr.rel (!%p17_p2) target bundleno = 6 (0x6), region = 83 }
 0x1b8   :  { %350 = vsyncpa [#allocation4], 1 }
 0x1b9   :  { %352 = vsyncpa [#allocation4 + $0x1], 1 }
 0x1ba   :  { %353 = vsyncpa [#allocation7], 1 }
 0x1bb   :  { %354 = vsyncpa [#allocation5], 1 }
 0x1bc   :  { %356 = vsyncpa [#allocation5 + $0x1], 1 }

</bundles_post_ra>
